<compile_context>
chip_gen: v7x
topology: tpu7x:2x2x1
jax: 0.10.0
libtpu: 0.0.40
codegen_flags: <defaults>
</compile_context>

<pallas_src>
import functools

import jax
import jax.numpy as jnp
from jax.experimental import pallas as pl
from jax.experimental.pallas import tpu as pltpu

EPS = 1e-5


def _round_up(n, m):
    return ((n + m - 1) // m) * m


# ---------------------------------------------------------------------------
# Pass 1: batch-norm statistics (batch-wide mean and rsqrt(var + eps)).
# ---------------------------------------------------------------------------
def _bn_stats_kernel(batch, x_ref, mean_ref, rstd_ref, sum_ref, sq_ref):
    i = pl.program_id(0)
    tb = x_ref.shape[0]

    @pl.when(i == 0)
    def _init():
        sum_ref[...] = jnp.zeros_like(sum_ref)
        sq_ref[...] = jnp.zeros_like(sq_ref)

    x = x_ref[...].astype(jnp.float32)
    # Mask rows past the true batch size (the last tile may be partial; its
    # out-of-bounds rows hold garbage).
    row = jax.lax.broadcasted_iota(jnp.int32, x.shape, 0) + i * tb
    x = jnp.where(row < batch, x, 0.0)

    sum_ref[...] += jnp.sum(x, axis=0, keepdims=True)
    sq_ref[...] += jnp.sum(x * x, axis=0, keepdims=True)

    @pl.when(i == pl.num_programs(0) - 1)
    def _finalize():
        inv_n = jnp.float32(1.0 / batch)
        mean = sum_ref[...] * inv_n
        var = sq_ref[...] * inv_n - mean * mean   # biased (training-mode) var
        mean_ref[...] = mean
        rstd_ref[...] = jax.lax.rsqrt(var + EPS)


def _batch_stats(x, tb):
    batch, feat = x.shape
    num_tiles = pl.cdiv(batch, tb)
    kernel = functools.partial(_bn_stats_kernel, batch)
    return pl.pallas_call(
        kernel,
        grid=(num_tiles,),
        in_specs=[pl.BlockSpec((tb, feat), lambda i: (i, 0))],
        out_specs=(pl.BlockSpec((1, feat), lambda i: (0, 0)),
                   pl.BlockSpec((1, feat), lambda i: (0, 0))),
        out_shape=(jax.ShapeDtypeStruct((1, feat), jnp.float32),
                   jax.ShapeDtypeStruct((1, feat), jnp.float32)),
        scratch_shapes=[pltpu.VMEM((1, feat), jnp.float32),
                        pltpu.VMEM((1, feat), jnp.float32)],
        compiler_params=pltpu.CompilerParams(
            dimension_semantics=("arbitrary",)),
    )(x)


# ---------------------------------------------------------------------------
# Pass 2: normalize + MLP, tiled over batch ("parallel" grid axis).
# ---------------------------------------------------------------------------
def _dnn_mlp_kernel(num_tanh, mean_ref, rstd_ref, x_ref, *refs):
    out_ref = refs[-1]
    wb = refs[:-1]
    ws = wb[0::2]
    bs = wb[1::2]

    # BatchNorm1d(input_size, affine=False) with precomputed batch stats.
    x = (x_ref[...].astype(jnp.float32) - mean_ref[...]) * rstd_ref[...]

    # Linear -> tanh layers; the 5*a[i] scale is already folded into W_i, b_i.
    for i in range(num_tanh):
        w = ws[i][...]
        h = jnp.dot(x.astype(w.dtype), w,
                    preferred_element_type=jnp.float32) + bs[i][...]
        x = jnp.tanh(h)

    # Output layer; 5*a[-1] folded into W_last, columns zero-padded to a
    # multiple of 128 so this store is lane-dense.
    w = ws[num_tanh][...]
    out = jnp.dot(x.astype(w.dtype), w,
                  preferred_element_type=jnp.float32) + bs[num_tanh][...]
    out_ref[...] = out.astype(out_ref.dtype)


def _fold_params(a, weights, biases, out_pad, weight_dtype):
    """Fold the 5*a[i] scales into the linear layers.

    tanh layer i : tanh(5*a[i]*(x@W_i + b_i)) == tanh(x@(5*a[i]*W_i) + 5*a[i]*b_i)
    output layer : (5*a[-1]*x)@W_L + b_L      == x@(5*a[-1]*W_L) + b_L
    """
    num_tanh = len(weights) - 1
    ws, bs = [], []
    for i in range(num_tanh):
        s = 5.0 * a[i]
        ws.append((s * weights[i]).astype(weight_dtype))
        bs.append((s * biases[i]).reshape(1, -1).astype(jnp.float32))
    w_last = (5.0 * a[-1]) * weights[-1]
    b_last = biases[-1]
    pad = out_pad - w_last.shape[1]
    if pad:
        w_last = jnp.pad(w_last, ((0, 0), (0, pad)))
        b_last = jnp.pad(b_last, (0, pad))
    ws.append(w_last.astype(weight_dtype))
    bs.append(b_last.reshape(1, -1).astype(jnp.float32))
    return ws, bs


def dnn_forward(x, a, weights, biases, *, tile_batch=512,
                weight_dtype=jnp.float32):
    """Pallas forward pass. x: (B, input_size) -> (B, output_size) f32."""
    x = x.astype(jnp.float32)
    batch, feat = x.shape
    out_dim = weights[-1].shape[1]
    out_pad = _round_up(out_dim, 128)            # lane-dense output stores
    num_tanh = len(weights) - 1
    assert a.shape[0] == num_tanh + 2

    if batch <= tile_batch:
        tb = batch                               # single full block
    else:
        assert tile_batch % 8 == 0, "tile_batch must be a multiple of 8"
        tb = tile_batch
    num_tiles = pl.cdiv(batch, tb)

    mean, rstd = _batch_stats(x, tb)
    ws, bs = _fold_params(a, weights, biases, out_pad, weight_dtype)

    def const_spec(shape):                       # VMEM-resident across steps
        return pl.BlockSpec(shape, lambda i: (0,) * len(shape))

    in_specs = [const_spec((1, feat)),                        # mean
                const_spec((1, feat)),                        # rstd
                pl.BlockSpec((tb, feat), lambda i: (i, 0))]   # x tile
    args = [mean, rstd, x]
    for w, b in zip(ws, bs):
        in_specs += [const_spec(w.shape), const_spec(b.shape)]
        args += [w, b]

    kernel = functools.partial(_dnn_mlp_kernel, num_tanh)
    out = pl.pallas_call(
        kernel,
        grid=(num_tiles,),
        in_specs=in_specs,
        out_specs=pl.BlockSpec((tb, out_pad), lambda i: (i, 0)),
        out_shape=jax.ShapeDtypeStruct((batch, out_pad), jnp.float32),
        compiler_params=pltpu.CompilerParams(
            dimension_semantics=("parallel",)),
    )(*args)
    return out[:, :out_dim]


# ---------------------------------------------------------------------------
# Pure-JAX references.
# ---------------------------------------------------------------------------
def dnn_reference(x, a, weights, biases):
    """Mirrors the PyTorch forward pass exactly (scale applied after Linear)."""
    mean = jnp.mean(x, axis=0, keepdims=True)
    var = jnp.mean((x - mean) ** 2, axis=0, keepdims=True)
    x = (x - mean) / jnp.sqrt(var + EPS)
    num_tanh = len(weights) - 1
    for i in range(num_tanh):
        x = x @ weights[i] + biases[i]
        x = jnp.tanh(5.0 * a[i] * x)
    x = 5.0 * a[-1] * x
    x = x @ weights[-1] + biases[-1]
    return x


def dnn_reference_folded(x, a, weights, biases):
    """Same math, associated like the kernel (for a tight numerics check)."""
    mean = jnp.mean(x, axis=0, keepdims=True)
    var = jnp.mean(x * x, axis=0, keepdims=True) - mean * mean
    x = (x - mean) * jax.lax.rsqrt(var + EPS)
    num_tanh = len(weights) - 1
    for i in range(num_tanh):
        s = 5.0 * a[i]
        x = jnp.tanh(x @ (s * weights[i]) + s * biases[i])
    return x @ ((5.0 * a[-1]) * weights[-1]) + biases[-1]


def init_params(layers, key):
    """Deterministic init matching the module's shapes (weights as (in, out))."""
    weights, biases = [], []
    for din, dout in zip(layers[:-1], layers[1:]):
        key, k_w, k_b = jax.random.split(key, 3)
        bound = 1.0 / jnp.sqrt(jnp.float32(din))
        weights.append(
            jax.random.uniform(k_w, (din, dout), jnp.float32, -bound, bound))
        biases.append(
            jax.random.uniform(k_b, (dout,), jnp.float32, -bound, bound))
    num_layers = len(layers) - 2                 # number of hidden widths
    a = jnp.full((num_layers + 2,), 0.2, dtype=jnp.float32)
    return a, weights, biases


if __name__ == "__main__":
    # layers = [input_size, hidden widths..., output_size]
    layers = [16, 32, 32, 32, 8]
    batch = 512

    key = jax.random.PRNGKey(0)
    key, k_x = jax.random.split(key)
    x = jax.random.normal(k_x, (batch, layers[0]), dtype=jnp.float32)
    a, weights, biases = init_params(layers, key)

    ref_fold = dnn_reference_folded(x, a, weights, biases)
    ref_torch = dnn_reference(x, a, weights, biases)

    # (A) f32 weights, 2-step batch grid (tile=256).
    out = jax.block_until_ready(dnn_forward(x, a, weights, biases,
                                            tile_batch=256))
    assert out.shape == (batch, layers[-1]), out.shape
    assert jnp.allclose(out, ref_fold, rtol=2e-4, atol=2e-4), (
        float(jnp.max(jnp.abs(out - ref_fold))))
    assert jnp.allclose(out, ref_torch, rtol=1e-2, atol=1e-2), (
        float(jnp.max(jnp.abs(out - ref_torch))))

    # (B) bf16 matmul operands (v6e/v7x MXU-native); f32 accumulate/tanh.
    out_bf16 = jax.block_until_ready(
        dnn_forward(x, a, weights, biases, tile_batch=256,
                    weight_dtype=jnp.bfloat16))
    assert jnp.allclose(out_bf16, ref_torch, rtol=5e-2, atol=5e-2), (
        float(jnp.max(jnp.abs(out_bf16 - ref_torch))))

    # (C) batch not a multiple of the tile: partial last block + masked stats.
    x2 = x[:200]
    out2 = jax.block_until_ready(dnn_forward(x2, a, weights, biases,
                                             tile_batch=128))
    ref2 = dnn_reference(x2, a, weights, biases)
    assert out2.shape == (200, layers[-1]), out2.shape
    assert jnp.allclose(out2, ref2, rtol=1e-2, atol=1e-2), (
        float(jnp.max(jnp.abs(out2 - ref2))))

    print("KERNEL_OK")
</pallas_src>

<mosaic_0001>
module attributes {stable_mosaic.version = 11 : i64} {
  func.func @_bn_stats_kernel(%arg0: i32, %arg1: memref<256x16xf32, #tpu.memory_space<vmem>>, %arg2: memref<1x16xf32, #tpu.memory_space<vmem>>, %arg3: memref<1x16xf32, #tpu.memory_space<vmem>>, %arg4: memref<1x16xf32, #tpu.memory_space<vmem>>, %arg5: memref<1x16xf32, #tpu.memory_space<vmem>>) attributes {dimension_semantics = [#tpu.dimension_semantics<arbitrary>], iteration_bounds = array<i64: 2>, scalar_prefetch = 0 : i64, scratch_operands = 2 : i64, tpu.core_type = #tpu.core_type<tc>, window_params = [{transform_indices = @transform_0, window_bounds = array<i64: 256, 16>}, {pipeline_mode = #tpu.pipeline_mode<synchronous>, transform_indices = @transform_1, window_bounds = array<i64: 1, 16>}, {pipeline_mode = #tpu.pipeline_mode<synchronous>, transform_indices = @transform_2, window_bounds = array<i64: 1, 16>}]} {
    %c0_i32 = arith.constant 0 : i32
    %0 = arith.cmpi eq, %arg0, %c0_i32 : i32
    %1 = arith.extui %0 : i1 to i32
    %c0_i32_0 = arith.constant 0 : i32
    %2 = arith.cmpi ne, %1, %c0_i32_0 : i32
    scf.if %2 {
      %cst_13 = arith.constant 0.000000e+00 : f32
      %26 = vector.broadcast %cst_13 : f32 to vector<1x16xf32>
      %c0_14 = arith.constant 0 : index
      %c0_15 = arith.constant 0 : index
      %27 = vector.load %arg4[%c0_14, %c0_15] : memref<1x16xf32, #tpu.memory_space<vmem>>, vector<1x16xf32>
      tpu.vector_store %arg4[%c0_14, %c0_15], %26 {strides = array<i32>} : memref<1x16xf32, #tpu.memory_space<vmem>>, vector<1x16xf32>,
      %cst_16 = arith.constant 0.000000e+00 : f32
      %28 = vector.broadcast %cst_16 : f32 to vector<1x16xf32>
      %c0_17 = arith.constant 0 : index
      %c0_18 = arith.constant 0 : index
      %29 = vector.load %arg5[%c0_17, %c0_18] : memref<1x16xf32, #tpu.memory_space<vmem>>, vector<1x16xf32>
      tpu.vector_store %arg5[%c0_17, %c0_18], %28 {strides = array<i32>} : memref<1x16xf32, #tpu.memory_space<vmem>>, vector<1x16xf32>,
    } else {
    }
    %c0 = arith.constant 0 : index
    %c0_1 = arith.constant 0 : index
    %3 = vector.load %arg1[%c0, %c0_1] : memref<256x16xf32, #tpu.memory_space<vmem>>, vector<256x16xf32>
    %4 = tpu.iota {dimensions = array<i32: 0>} : vector<256x16xi32>
    %c256_i32 = arith.constant 256 : i32
    %5 = arith.muli %arg0, %c256_i32 : i32
    %6 = vector.broadcast %5 : i32 to vector<256x16xi32>
    %7 = arith.addi %4, %6 : vector<256x16xi32>
    %c512_i32 = arith.constant 512 : i32
    %8 = vector.broadcast %c512_i32 : i32 to vector<256x16xi32>
    %9 = arith.cmpi slt, %7, %8 : vector<256x16xi32>
    %cst = arith.constant 0.000000e+00 : f32
    %10 = vector.broadcast %cst : f32 to vector<256x16xf32>
    %11 = arith.select %9, %3, %10 : vector<256x16xi1>, vector<256x16xf32>
    %c0_2 = arith.constant 0 : index
    %c0_3 = arith.constant 0 : index
    %12 = vector.load %arg4[%c0_2, %c0_3] : memref<1x16xf32, #tpu.memory_space<vmem>>, vector<1x16xf32>
    %cst_4 = arith.constant dense<0.000000e+00> : vector<16xf32>
    %13 = vector.multi_reduction <add>, %11, %cst_4 [0] : vector<256x16xf32> to vector<16xf32>
    %14 = vector.shape_cast %13 : vector<16xf32> to vector<1x16xf32>
    %15 = arith.addf %12, %14 : vector<1x16xf32>
    %c0_5 = arith.constant 0 : index
    %c0_6 = arith.constant 0 : index
    %16 = vector.load %arg4[%c0_5, %c0_6] : memref<1x16xf32, #tpu.memory_space<vmem>>, vector<1x16xf32>
    tpu.vector_store %arg4[%c0_5, %c0_6], %15 {strides = array<i32>} : memref<1x16xf32, #tpu.memory_space<vmem>>, vector<1x16xf32>,
    %c0_7 = arith.constant 0 : index
    %c0_8 = arith.constant 0 : index
    %17 = vector.load %arg5[%c0_7, %c0_8] : memref<1x16xf32, #tpu.memory_space<vmem>>, vector<1x16xf32>
    %18 = arith.mulf %11, %11 : vector<256x16xf32>
    %cst_9 = arith.constant dense<0.000000e+00> : vector<16xf32>
    %19 = vector.multi_reduction <add>, %18, %cst_9 [0] : vector<256x16xf32> to vector<16xf32>
    %20 = vector.shape_cast %19 : vector<16xf32> to vector<1x16xf32>
    %21 = arith.addf %17, %20 : vector<1x16xf32>
    %c0_10 = arith.constant 0 : index
    %c0_11 = arith.constant 0 : index
    %22 = vector.load %arg5[%c0_10, %c0_11] : memref<1x16xf32, #tpu.memory_space<vmem>>, vector<1x16xf32>
    tpu.vector_store %arg5[%c0_10, %c0_11], %21 {strides = array<i32>} : memref<1x16xf32, #tpu.memory_space<vmem>>, vector<1x16xf32>,
    %c1_i32 = arith.constant 1 : i32
    %23 = arith.cmpi eq, %arg0, %c1_i32 : i32
    %24 = arith.extui %23 : i1 to i32
    %c0_i32_12 = arith.constant 0 : i32
    %25 = arith.cmpi ne, %24, %c0_i32_12 : i32
    scf.if %25 {
      %c0_13 = arith.constant 0 : index
      %c0_14 = arith.constant 0 : index
      %26 = vector.load %arg4[%c0_13, %c0_14] : memref<1x16xf32, #tpu.memory_space<vmem>>, vector<1x16xf32>
      %cst_15 = arith.constant 0.001953125 : f32
      %27 = vector.broadcast %cst_15 : f32 to vector<1x16xf32>
      %28 = arith.mulf %26, %27 : vector<1x16xf32>
      %c0_16 = arith.constant 0 : index
      %c0_17 = arith.constant 0 : index
      %29 = vector.load %arg5[%c0_16, %c0_17] : memref<1x16xf32, #tpu.memory_space<vmem>>, vector<1x16xf32>
      %cst_18 = arith.constant 0.001953125 : f32
      %30 = vector.broadcast %cst_18 : f32 to vector<1x16xf32>
      %31 = arith.mulf %29, %30 : vector<1x16xf32>
      %32 = arith.mulf %28, %28 : vector<1x16xf32>
      %33 = arith.subf %31, %32 : vector<1x16xf32>
      %c0_19 = arith.constant 0 : index
      %c0_20 = arith.constant 0 : index
      %34 = vector.load %arg2[%c0_19, %c0_20] : memref<1x16xf32, #tpu.memory_space<vmem>>, vector<1x16xf32>
      tpu.vector_store %arg2[%c0_19, %c0_20], %28 {strides = array<i32>} : memref<1x16xf32, #tpu.memory_space<vmem>>, vector<1x16xf32>,
      %cst_21 = arith.constant 9.99999974E-6 : f32
      %35 = vector.broadcast %cst_21 : f32 to vector<1x16xf32>
      %36 = arith.addf %33, %35 : vector<1x16xf32>
      %37 = math.rsqrt %36 : vector<1x16xf32>
      %c0_22 = arith.constant 0 : index
      %c0_23 = arith.constant 0 : index
      %38 = vector.load %arg3[%c0_22, %c0_23] : memref<1x16xf32, #tpu.memory_space<vmem>>, vector<1x16xf32>
      tpu.vector_store %arg3[%c0_22, %c0_23], %37 {strides = array<i32>} : memref<1x16xf32, #tpu.memory_space<vmem>>, vector<1x16xf32>,
    } else {
    }
    return
  }
  func.func @transform_0(%arg0: i32) -> (i32, i32) {
    %c0_i32 = arith.constant 0 : i32
    %c0_i32_0 = arith.constant 0 : i32
    return %arg0, %c0_i32 : i32, i32
  }
  func.func @transform_1(%arg0: i32) -> (i32, i32) {
    %c0_i32 = arith.constant 0 : i32
    %c0_i32_0 = arith.constant 0 : i32
    %c0_i32_1 = arith.constant 0 : i32
    return %c0_i32, %c0_i32_0 : i32, i32
  }
  func.func @transform_2(%arg0: i32) -> (i32, i32) {
    %c0_i32 = arith.constant 0 : i32
    %c0_i32_0 = arith.constant 0 : i32
    %c0_i32_1 = arith.constant 0 : i32
    return %c0_i32, %c0_i32_0 : i32, i32
  }
}

</mosaic_0001>

<bundles_post_ra>
// kernel: tpu_custom_call.1
= control target key start
LH: loop header
LB: loop body
LE: loop exit
PB: predicated region body
PF: predicated region fallthrough
CT: control target
= control target key end

     0   :  { %8 = vsyncpa [#allocation5], 0  ;;  %s1100_s0 = inlined_call_operand.vmem [shape: f32[512,16], index: 0, kind: input, shape index: {}]   ;;  %s1101_s1 = inlined_call_operand.hbm [shape: f32[1,16], index: 1, kind: output, shape index: {0}]   ;;  %s1102_s2 = inlined_call_operand.hbm [shape: f32[1,16], index: 2, kind: output, shape index: {1}]  }
   0x1   :  { %9 = vsyncpa [#allocation7], 0  ;;  %s687_s9 = smov 0  }
   0x2 LB: > { %s693_s10 = sadd.s32 4294967295, %s667_s9   ;;  %p564_p0 = scmp.ge.s32.totalorder %s667_s9, 1  ;;  %s667_s9 = sphi %s687_s9, %s15_s9  }
   0x3   : > { %p108_p1 = scmp.lt.s32.totalorder %s667_s9, 3 }
   0x5   : > { %p109_p2 = pnand %p564_p0, %p108_p1 }
   0x6   : > { %s565_s11 = sshll.u32 (!%p109_p2), %s693_s10, 5  ;;  %p567_p4 = scmp.ne.s32.totalorder (!%p109_p2), %s693_s10, 0 }
   0x7   : > { %112 = sbr.rel (%p109_p2) target bundleno = 201 (0xc9), region = 24  ;;  %p126_p3 = scmp.lt.s32.totalorder (!%p109_p2), %s565_s11, 63 }
   0xe   : > { %s1104_s11 = smov (!%p126_p3, %s565_s11), 63  ;;  %134 = sbr.rel (%p567_p4) target bundleno = 21 (0x15), region = 28 }
   0xf   : > { %s566_s12 = sshll.u32 %s1104_s11, 3  ;;  %vm135_vm0 = vcmask (!%p567_p4), 122880   ;;  %v669_v0 = vmov (!%p567_p4), 0.0  }
  0x10   : > { %s701_s15 = scalar_lea.vmem %s1100_s0, %s566_s12  ;;  %136 = vst.msk [vmem:[#allocation2] sm:$0x1] (!%p567_p4), %vm135_vm0, %v669_v0  ;;  %137 = vst.msk [vmem:[#allocation3] sm:$0x1] (!%p567_p4), %vm135_vm0, %v669_v0 }
  0x15 PF: > { %v170_v1 = vlaneseq  ;;  %s568_s16 = sshll.u32 %s693_s10, 8  ;;  %vm302_vm1 = vcmask 130048   ;;  %v138_v14 = vld [vmem:[%s701_s15] sm:$0xff]  ;;  %v139_v15 = vld [vmem:[%s701_s15 + $0x8] sm:$0xff]  ;;  %v140_v16 = vld [vmem:[%s701_s15 + $0x10] sm:$0xff]  ;;  %p569_p5 = scmp.ne.s32.totalorder %s693_s10, 1 }
  0x16   : > { %v709_v5 = vstv %s568_s16  ;;  %v141_v22 = vld [vmem:[%s701_s15 + $0x18] sm:$0xff]  ;;  %v142_v30 = vld [vmem:[%s701_s15 + $0x20] sm:$0xff]  ;;  %v143_v38 = vld [vmem:[%s701_s15 + $0x28] sm:$0xff] }
  0x17   : > { %v704_v2 = vshrl.u32 %v170_v1, 7  ;;  %v144_v46 = vld [vmem:[%s701_s15 + $0x30] sm:$0xff]  ;;  %v145_v54 = vld [vmem:[%s701_s15 + $0x38] sm:$0xff]  ;;  %v146_v62 = vld [vmem:[%s701_s15 + $0x40] sm:$0xff] }
  0x19   : > { %v172_v3 = vadd.s32 8, %v704_v2  ;;  %v173_v4 = vadd.s32 16, %v704_v2  ;;  %v174_v6 = vadd.s32 24, %v704_v2  ;;  %v175_v7 = vadd.s32 32, %v704_v2 }
  0x1a   : > { %v205_v8 = vadd.s32 %v709_v5, %v704_v2  ;;  %v176_v11 = vadd.s32 40, %v704_v2  ;;  %v177_v13 = vadd.s32 48, %v704_v2  ;;  %v178_v18 = vadd.s32 56, %v704_v2 }
  0x1b   : > { %v206_v9 = vadd.s32 %v709_v5, %v172_v3  ;;  %v207_v10 = vadd.s32 %v709_v5, %v173_v4  ;;  %v208_v12 = vadd.s32 %v709_v5, %v174_v6  ;;  %v209_v17 = vadd.s32 %v709_v5, %v175_v7 }
  0x1c   : > { %vm237_vm2 = vcmp.lt.s32.totalorder %v205_v8, 512  ;;  %v179_v19 = vadd.s32 64, %v704_v2  ;;  %v180_v20 = vadd.s32 72, %v704_v2  ;;  %v181_v21 = vadd.s32 80, %v704_v2  ;;  %v147_v8 = vld [vmem:[%s701_s15 + $0x48] sm:$0xff] }
  0x1d   : > { %vm238_vm3 = vcmp.lt.s32.totalorder %v206_v9, 512  ;;  %vm239_vm4 = vcmp.lt.s32.totalorder %v207_v10, 512  ;;  %v182_v23 = vadd.s32 88, %v704_v2  ;;  %v731_v24 = vadd.s32 96, %v704_v2 }
  0x1e   : > { %v210_v25 = vadd.s32 %v709_v5, %v176_v11  ;;  %vm240_vm5 = vcmp.lt.s32.totalorder %v208_v12, 512  ;;  %v211_v26 = vadd.s32 %v709_v5, %v177_v13  ;;  %v735_v27 = vsel %vm237_vm2, %v138_v14, 0.0 }
  0x1f   : > { %v737_v28 = vsel %vm238_vm3, %v139_v15, 0.0  ;;  %v739_v29 = vsel %vm239_vm4, %v140_v16, 0.0  ;;  %vm241_vm6 = vcmp.lt.s32.totalorder %v209_v17, 512  ;;  %v303_v31 = vsel %vm302_vm1, %v735_v27, 0.0  ;;  %v148_v16 = vld [vmem:[%s701_s15 + $0x50] sm:$0xff] }
  0x20   : > { %v304_v32 = vsel %vm302_vm1, %v737_v28, 0.0  ;;  %v306_v33 = vsel %vm302_vm1, %v739_v29, 0.0  ;;  %v184_v34 = vadd.s32 104, %v704_v2  ;;  %v750_v35 = vadd.s32 112, %v704_v2 }
  0x21   : > { %v752_v36 = vsel %vm240_vm5, %v141_v22, 0.0  ;;  %v305_v37 = vadd.f32 %v304_v32, %v303_v31  ;;  %v756_v39 = vadd.s32 120, %v704_v2  ;;  %v212_v40 = vadd.s32 %v709_v5, %v178_v18 }
  0x22   : > { %vm242_vm7 = vcmp.lt.s32.totalorder %v210_v25, 512  ;;  %v308_v41 = vsel %vm302_vm1, %v752_v36, 0.0  ;;  %v762_v42 = vadd.s32 128, %v704_v2  ;;  %v765_v43 = vadd.s32 136, %v704_v2 }
  0x23   : > { %v767_v44 = vsel %vm241_vm6, %v142_v30, 0.0  ;;  %v307_v45 = vadd.f32 %v306_v33, %v305_v37  ;;  %v771_v47 = vadd.s32 144, %v704_v2  ;;  %v213_v48 = vadd.s32 %v709_v5, %v179_v19  ;;  %v150_v37 = vld [vmem:[%s701_s15 + $0x60] sm:$0xff] }
  0x24   : > { %vm243_vm8 = vcmp.lt.s32.totalorder %v211_v26, 512  ;;  %v310_v49 = vsel %vm302_vm1, %v767_v44, 0.0  ;;  %v777_v50 = vadd.s32 152, %v704_v2  ;;  %v780_v51 = vadd.s32 160, %v704_v2 }
  0x25   : > { %v782_v52 = vsel %vm242_vm7, %v143_v38, 0.0  ;;  %v309_v53 = vadd.f32 %v308_v41, %v307_v45  ;;  %v786_v55 = vadd.s32 168, %v704_v2  ;;  %v214_v56 = vadd.s32 %v709_v5, %v180_v20  ;;  %v149_v20 = vld [vmem:[%s701_s15 + $0x58] sm:$0xff] }
  0x26   : > { %vm244_vm9 = vcmp.lt.s32.totalorder %v212_v40, 512  ;;  %v312_v57 = vsel %vm302_vm1, %v782_v52, 0.0  ;;  %v792_v58 = vadd.s32 176, %v704_v2  ;;  %v795_v59 = vadd.s32 184, %v704_v2  ;;  %v151_v40 = vld [vmem:[%s701_s15 + $0x68] sm:$0xff] }
  0x27   : > { %v797_v60 = vsel %vm243_vm8, %v144_v46, 0.0  ;;  %v311_v61 = vadd.f32 %v310_v49, %v309_v53  ;;  %v801_v63 = vadd.s32 192, %v704_v2  ;;  %v215_v0 = vadd.s32 %v709_v5, %v181_v21 }
  0x28   : > { %vm245_vm10 = vcmp.lt.s32.totalorder %v213_v48, 512  ;;  %v314_v1 = vsel %vm302_vm1, %v797_v60, 0.0  ;;  %v807_v3 = vadd.s32 200, %v704_v2  ;;  %v216_v4 = vadd.s32 %v709_v5, %v182_v23 }
  0x29   : > { %v810_v6 = vsel %vm244_vm9, %v145_v54, 0.0  ;;  %v313_v7 = vadd.f32 %v312_v57, %v311_v61  ;;  %v814_v9 = vadd.s32 208, %v704_v2  ;;  %v817_v10 = vadd.s32 216, %v704_v2  ;;  %v152_v54 = vld [vmem:[%s701_s15 + $0x70] sm:$0xff] }
  0x2a   : > { %vm246_vm11 = vcmp.lt.s32.totalorder %v214_v56, 512  ;;  %v316_v11 = vsel %vm302_vm1, %v810_v6, 0.0  ;;  %v822_v12 = vadd.s32 224, %v704_v2  ;;  %v825_v13 = vadd.s32 232, %v704_v2 }
  0x2b   : > { %v827_v14 = vsel %vm245_vm10, %v146_v62, 0.0  ;;  %v315_v15 = vadd.f32 %v314_v1, %v313_v7  ;;  %v831_v17 = vadd.s32 240, %v704_v2  ;;  %v217_v18 = vadd.s32 %v709_v5, %v731_v24  ;;  %v153_v1 = vld [vmem:[%s701_s15 + $0x78] sm:$0xff] }
  0x2c   : > { %vm247_vm12 = vcmp.lt.s32.totalorder %v215_v0, 512  ;;  %v318_v19 = vsel %vm302_vm1, %v827_v14, 0.0  ;;  %v218_v21 = vadd.s32 %v709_v5, %v184_v34  ;;  %vm248_vm13 = vcmp.lt.s32.totalorder %v216_v4, 512 }
  0x2d   : > { %v839_v22 = vsel %vm246_vm11, %v147_v8, 0.0  ;;  %v317_v23 = vadd.f32 %v316_v11, %v315_v15  ;;  %v376_v26 = vmul.f32 %v735_v27, %v735_v27  ;;  %v377_v24 = vmul.f32 %v737_v28, %v737_v28 }
  0x2e   : > { %v320_v25 = vsel %vm302_vm1, %v839_v22, 0.0  ;;  %v378_v30 = vmul.f32 %v739_v29, %v739_v29  ;;  %v850_v31 = vadd.s32 248, %v704_v2  ;;  %v219_v32 = vadd.s32 %v709_v5, %v750_v35 }
  0x2f   : > { %v854_v33 = vsel %vm247_vm12, %v148_v16, 0.0  ;;  %v319_v34 = vadd.f32 %v318_v19, %v317_v23  ;;  %vm249_vm14 = vcmp.lt.s32.totalorder %v217_v18, 512  ;;  %v857_v38 = vsel %vm248_vm13, %v149_v20, 0.0  ;;  %v154_v16 = vld [vmem:[%s701_s15 + $0x80] sm:$0xff] }
  0x30   : > { %v322_v27 = vsel %vm302_vm1, %v854_v33, 0.0  ;;  %v379_v28 = vmul.f32 %v752_v36, %v752_v36  ;;  %v220_v2 = vadd.s32 %v709_v5, %v756_v39  ;;  %vm250_vm15 = vcmp.lt.s32.totalorder %v218_v21, 512 }
  0x31   : > { %v321_v29 = vadd.f32 %v320_v25, %v319_v34  ;;  %v324_v35 = vsel %vm302_vm1, %v857_v38, 0.0  ;;  %v380_v41 = vmul.f32 %v767_v44, %v767_v44  ;;  %v408_v45 = vsel %vm302_vm1, %v376_v26, 0.0  ;;  %v155_v25 = vld [vmem:[%s701_s15 + $0x88] sm:$0xff] }
  0x32   : > { %v409_v46 = vsel %vm302_vm1, %v377_v24, 0.0  ;;  %v411_v48 = vsel %vm302_vm1, %v378_v30, 0.0  ;;  %v221_v36 = vadd.s32 %v709_v5, %v762_v42  ;;  %v875_v39 = vsel %vm249_vm14, %v150_v37, 0.0  ;;  %v156_v37 = vld [vmem:[%s701_s15 + $0x90] sm:$0xff] }
  0x33   : > { %v323_v49 = vadd.f32 %v322_v27, %v321_v29  ;;  %v410_v53 = vadd.f32 %v409_v46, %v408_v45  ;;  %vm251_vm0 = vcmp.lt.s32.totalorder %v219_v32, 512  ;;  %v326_v56 = vsel %vm302_vm1, %v875_v39, 0.0 }
  0x34   : > { %v381_v44 = vmul.f32 %v782_v52, %v782_v52  ;;  %v413_v57 = vsel %vm302_vm1, %v379_v28, 0.0  ;;  %v222_v61 = vadd.s32 %v709_v5, %v765_v43  ;;  %v886_v42 = vsel %vm250_vm15, %v151_v40, 0.0  ;;  %v157_v40 = vld [vmem:[%s701_s15 + $0x98] sm:$0xff] }
  0x35   : > { %v325_v62 = vadd.f32 %v324_v35, %v323_v49  ;;  %v412_v0 = vadd.f32 %v411_v48, %v410_v53  ;;  %vm252_vm2 = vcmp.lt.s32.totalorder %v220_v2, 512  ;;  %v328_v4 = vsel %vm302_vm1, %v886_v42, 0.0  ;;  %v158_v49 = vld [vmem:[%s701_s15 + $0xa0] sm:$0xff] }
  0x36   : > { %v382_v7 = vmul.f32 %v797_v60, %v797_v60  ;;  %v415_v52 = vsel %vm302_vm1, %v380_v41, 0.0  ;;  %v223_v8 = vadd.s32 %v709_v5, %v771_v47  ;;  %v896_v43 = vsel %vm251_vm0, %v152_v54, 0.0 }
  0x37   : > { %v327_v11 = vadd.f32 %v326_v56, %v325_v62  ;;  %v414_v15 = vadd.f32 %v413_v57, %v412_v0  ;;  %vm253_vm3 = vcmp.lt.s32.totalorder %v221_v36, 512  ;;  %v330_v18 = vsel %vm302_vm1, %v896_v43, 0.0 }
  0x38   : > { %v383_v19 = vmul.f32 %v810_v6, %v810_v6  ;;  %v417_v60 = vsel %vm302_vm1, %v381_v44, 0.0  ;;  %v224_v20 = vadd.s32 %v709_v5, %v777_v50  ;;  %v906_v21 = vsel %vm252_vm2, %v153_v1, 0.0 }
  0x39   : > { %v329_v47 = vadd.f32 %v328_v4, %v327_v11  ;;  %v416_v23 = vadd.f32 %v415_v52, %v414_v15  ;;  %vm254_vm4 = vcmp.lt.s32.totalorder %v222_v61, 512  ;;  %v332_v26 = vsel %vm302_vm1, %v906_v21, 0.0  ;;  %v159_v61 = vld [vmem:[%s701_s15 + $0xa8] sm:$0xff]  ;;  %v160_v52 = vld [vmem:[%s701_s15 + $0xb0] sm:$0xff] }
  0x3a   : > { %v384_v24 = vmul.f32 %v827_v14, %v827_v14  ;;  %v419_v6 = vsel %vm302_vm1, %v382_v7, 0.0  ;;  %v225_v30 = vadd.s32 %v709_v5, %v780_v51  ;;  %v916_v32 = vsel %vm253_vm3, %v154_v16, 0.0 }
  0x3b   : > { %v331_v50 = vadd.f32 %v330_v18, %v329_v47  ;;  %v418_v34 = vadd.f32 %v417_v60, %v416_v23  ;;  %vm255_vm5 = vcmp.lt.s32.totalorder %v223_v8, 512  ;;  %v334_v27 = vsel %vm302_vm1, %v916_v32, 0.0 }
  0x3c   : > { %v385_v28 = vmul.f32 %v839_v22, %v839_v22  ;;  %v421_v14 = vsel %vm302_vm1, %v383_v19, 0.0  ;;  %v226_v2 = vadd.s32 %v709_v5, %v786_v55  ;;  %v926_v29 = vsel %vm254_vm4, %v155_v25, 0.0  ;;  %v161_v19 = vld [vmem:[%s701_s15 + $0xb8] sm:$0xff] }
  0x3d   : > { %v333_v51 = vadd.f32 %v332_v26, %v331_v50  ;;  %v420_v35 = vadd.f32 %v419_v6, %v418_v34  ;;  %vm256_vm6 = vcmp.lt.s32.totalorder %v224_v20, 512  ;;  %v336_v41 = vsel %vm302_vm1, %v926_v29, 0.0  ;;  %v162_v26 = vld [vmem:[%s701_s15 + $0xc0] sm:$0xff] }
  0x3e   : > { %v386_v45 = vmul.f32 %v854_v33, %v854_v33  ;;  %v423_v22 = vsel %vm302_vm1, %v384_v24, 0.0  ;;  %v227_v46 = vadd.s32 %v709_v5, %v792_v58  ;;  %v936_v48 = vsel %vm255_vm5, %v156_v37, 0.0  ;;  %v163_v37 = vld [vmem:[%s701_s15 + $0xc8] sm:$0xff] }
  0x3f   : > { %v335_v55 = vadd.f32 %v334_v27, %v333_v51  ;;  %v422_v36 = vadd.f32 %v421_v14, %v420_v35  ;;  %vm257_vm7 = vcmp.lt.s32.totalorder %v225_v30, 512  ;;  %v338_v53 = vsel %vm302_vm1, %v936_v48, 0.0  ;;  %v164_v35 = vld [vmem:[%s701_s15 + $0xd0] sm:$0xff] }
  0x40   : > { %v387_v54 = vmul.f32 %v857_v38, %v857_v38  ;;  %v425_v33 = vsel %vm302_vm1, %v385_v28, 0.0  ;;  %v228_v56 = vadd.s32 %v709_v5, %v795_v59  ;;  %v946_v44 = vsel %vm256_vm6, %v157_v40, 0.0 }
  0x41   : > { %v337_v58 = vadd.f32 %v336_v41, %v335_v55  ;;  %v424_v57 = vadd.f32 %v423_v22, %v422_v36  ;;  %vm258_vm8 = vcmp.lt.s32.totalorder %v226_v2, 512  ;;  %v340_v62 = vsel %vm302_vm1, %v946_v44, 0.0 }
  0x42   : > { %v388_v0 = vmul.f32 %v875_v39, %v875_v39  ;;  %v427_v38 = vsel %vm302_vm1, %v386_v45, 0.0  ;;  %v229_v1 = vadd.s32 %v709_v5, %v801_v63  ;;  %v956_v4 = vsel %vm257_vm7, %v158_v49, 0.0 }
  0x43   : > { %v339_v59 = vadd.f32 %v338_v53, %v337_v58  ;;  %v426_v7 = vadd.f32 %v425_v33, %v424_v57  ;;  %vm259_vm9 = vcmp.lt.s32.totalorder %v227_v46, 512  ;;  %v342_v8 = vsel %vm302_vm1, %v956_v4, 0.0 }
  0x44   : > { %v389_v11 = vmul.f32 %v886_v42, %v886_v42  ;;  %v429_v39 = vsel %vm302_vm1, %v387_v54, 0.0  ;;  %v230_v15 = vadd.s32 %v709_v5, %v807_v3  ;;  %v966_v16 = vsel %vm258_vm8, %v159_v61, 0.0 }
  0x45   : > { %v341_v63 = vadd.f32 %v340_v62, %v339_v59  ;;  %v428_v18 = vadd.f32 %v427_v38, %v426_v7  ;;  %vm260_vm10 = vcmp.lt.s32.totalorder %v228_v56, 512  ;;  %v344_v60 = vsel %vm302_vm1, %v966_v16, 0.0 }
  0x46   : > { %v390_v20 = vmul.f32 %v896_v43, %v896_v43  ;;  %v431_v42 = vsel %vm302_vm1, %v388_v0, 0.0  ;;  %v231_v47 = vadd.s32 %v709_v5, %v814_v9  ;;  %v976_v23 = vsel %vm259_vm9, %v160_v52, 0.0 }
  0x47   : > { %v343_v3 = vadd.f32 %v342_v8, %v341_v63  ;;  %v430_v25 = vadd.f32 %v429_v39, %v428_v18  ;;  %vm261_vm11 = vcmp.lt.s32.totalorder %v229_v1, 512  ;;  %v346_v24 = vsel %vm302_vm1, %v976_v23, 0.0 }
  0x48   : > { %v391_v6 = vmul.f32 %v906_v21, %v906_v21  ;;  %v433_v43 = vsel %vm302_vm1, %v389_v11, 0.0  ;;  %v232_v30 = vadd.s32 %v709_v5, %v817_v10  ;;  %v986_v50 = vsel %vm260_vm10, %v161_v19, 0.0  ;;  %v168_v11 = vld [vmem:[%s701_s15 + $0xf0] sm:$0xff]  ;;  %v169_v19 = vld [vmem:[%s701_s15 + $0xf8] sm:$0xff] }
  0x49   : > { %v345_v9 = vadd.f32 %v344_v60, %v343_v3  ;;  %v432_v34 = vadd.f32 %v431_v42, %v430_v25  ;;  %vm262_vm12 = vcmp.lt.s32.totalorder %v230_v15, 512  ;;  %v348_v27 = vsel %vm302_vm1, %v986_v50, 0.0 }
  0x4a   : > { %v392_v28 = vmul.f32 %v916_v32, %v916_v32  ;;  %v435_v21 = vsel %vm302_vm1, %v390_v20, 0.0  ;;  %v233_v14 = vadd.s32 %v709_v5, %v822_v12  ;;  %v293_v2 = vsel %vm261_vm11, %v162_v26, 0.0  ;;  %v165_v12 = vld [vmem:[%s701_s15 + $0xd8] sm:$0xff] }
  0x4b   : > { %v347_v10 = vadd.f32 %v346_v24, %v345_v9  ;;  %v434_v51 = vadd.f32 %v433_v43, %v432_v34  ;;  %vm263_vm13 = vcmp.lt.s32.totalorder %v231_v47, 512  ;;  %v350_v40 = vsel %vm302_vm1, %v293_v2, 0.0 }
  0x4c   : > { %v393_v41 = vmul.f32 %v926_v29, %v926_v29  ;;  %v437_v45 = vsel %vm302_vm1, %v391_v6, 0.0  ;;  %v234_v32 = vadd.s32 %v709_v5, %v825_v13  ;;  %v294_v22 = vsel %vm262_vm12, %v163_v37, 0.0  ;;  %v166_v13 = vld [vmem:[%s701_s15 + $0xe0] sm:$0xff] }
  0x4d   : > { %v349_v46 = vadd.f32 %v348_v27, %v347_v10  ;;  %v436_v55 = vadd.f32 %v435_v21, %v434_v51  ;;  %vm264_vm14 = vcmp.lt.s32.totalorder %v232_v30, 512  ;;  %v352_v36 = vsel %vm302_vm1, %v294_v22, 0.0 }
  0x4e   : > { %v394_v49 = vmul.f32 %v936_v48, %v936_v48  ;;  %v439_v53 = vsel %vm302_vm1, %v392_v28, 0.0  ;;  %v235_v29 = vadd.s32 %v709_v5, %v831_v17  ;;  %v295_v54 = vsel %vm263_vm13, %v164_v35, 0.0  ;;  %v167_v17 = vld [vmem:[%s701_s15 + $0xe8] sm:$0xff] }
  0x4f   : > { %v351_v33 = vadd.f32 %v350_v40, %v349_v46  ;;  %v438_v56 = vadd.f32 %v437_v45, %v436_v55  ;;  %vm265_vm15 = vcmp.lt.s32.totalorder %v233_v14, 512  ;;  %v354_v58 = vsel %vm302_vm1, %v295_v54, 0.0 }
  0x50   : > { %v395_v57 = vmul.f32 %v946_v44, %v946_v44  ;;  %v441_v61 = vsel %vm302_vm1, %v393_v41, 0.0  ;;  %v236_v48 = vadd.s32 %v709_v5, %v850_v31  ;;  %v296_v62 = vsel %vm264_vm14, %v165_v12, 0.0 }
  0x51   : > { %v353_v0 = vadd.f32 %v352_v36, %v351_v33  ;;  %v440_v38 = vadd.f32 %v439_v53, %v438_v56  ;;  %vm266_vm0 = vcmp.lt.s32.totalorder %v234_v32, 512  ;;  %v356_v1 = vsel %vm302_vm1, %v296_v62, 0.0 }
  0x52   : > { %v396_v59 = vmul.f32 %v956_v4, %v956_v4  ;;  %v443_v7 = vsel %vm302_vm1, %v394_v49, 0.0  ;;  %v297_v52 = vsel %vm265_vm15, %v166_v13, 0.0  ;;  %vm267_vm2 = vcmp.lt.s32.totalorder %v235_v29, 512  ;;  %v301_v13 = vld [vmem:[#allocation2] sm:$0x1] }
  0x53   : > { %v355_v44 = vadd.f32 %v354_v58, %v353_v0  ;;  %v442_v8 = vadd.f32 %v441_v61, %v440_v38  ;;  %v358_v5 = vsel %vm302_vm1, %v297_v52, 0.0  ;;  %v397_v31 = vmul.f32 %v966_v16, %v966_v16 }
  0x54   : > { %v445_v39 = vsel %vm302_vm1, %v395_v57, 0.0  ;;  %v298_v15 = vsel %vm266_vm0, %v167_v17, 0.0  ;;  %vm268_vm3 = vcmp.lt.s32.totalorder %v236_v48, 512  ;;  %v398_v60 = vmul.f32 %v976_v23, %v976_v23 }
  0x55   : > { %v357_v63 = vadd.f32 %v356_v1, %v355_v44  ;;  %v444_v18 = vadd.f32 %v443_v7, %v442_v8  ;;  %v360_v4 = vsel %vm302_vm1, %v298_v15, 0.0  ;;  %v447_v20 = vsel %vm302_vm1, %v396_v59, 0.0 }
  0x56   : > { %v299_v42 = vsel %vm267_vm2, %v168_v11, 0.0  ;;  %v399_v16 = vmul.f32 %v986_v50, %v986_v50  ;;  %v449_v26 = vsel %vm302_vm1, %v397_v31, 0.0  ;;  %v300_v24 = vsel %vm268_vm3, %v169_v19, 0.0 }
  0x57   : > { %v359_v47 = vadd.f32 %v358_v5, %v357_v63  ;;  %v446_v3 = vadd.f32 %v445_v39, %v444_v18  ;;  %v362_v25 = vsel %vm302_vm1, %v299_v42, 0.0  ;;  %v364_v30 = vsel %vm302_vm1, %v300_v24, 0.0  ;;  %v375_v5 = vld [vmem:[#allocation3] sm:$0x1] }
  0x58   : > { %v400_v9 = vmul.f32 %v293_v2, %v293_v2  ;;  %v451_v23 = vsel %vm302_vm1, %v398_v60, 0.0  ;;  %v401_v27 = vmul.f32 %v294_v22, %v294_v22  ;;  %v453_v28 = vsel %vm302_vm1, %v399_v16, 0.0 }
  0x59   : > { %v361_v6 = vadd.f32 %v360_v4, %v359_v47  ;;  %v448_v43 = vadd.f32 %v447_v20, %v446_v3  ;;  %v402_v10 = vmul.f32 %v295_v54, %v295_v54  ;;  %v403_v40 = vmul.f32 %v296_v62, %v296_v62 }
  0x5a   : > { %v455_v50 = vsel %vm302_vm1, %v400_v9, 0.0  ;;  %v457_v41 = vsel %vm302_vm1, %v401_v27, 0.0  ;;  %v404_v2 = vmul.f32 %v297_v52, %v297_v52  ;;  %v405_v22 = vmul.f32 %v298_v15, %v298_v15 }
  0x5b   : > { %v363_v34 = vadd.f32 %v362_v25, %v361_v6  ;;  %v450_v37 = vadd.f32 %v449_v26, %v448_v43  ;;  %v459_v46 = vsel %vm302_vm1, %v402_v10, 0.0  ;;  %v461_v36 = vsel %vm302_vm1, %v403_v40, 0.0 }
  0x5c   : > { %v406_v29 = vmul.f32 %v299_v42, %v299_v42  ;;  %v463_v54 = vsel %vm302_vm1, %v404_v2, 0.0  ;;  %v407_v58 = vmul.f32 %v300_v24, %v300_v24  ;;  %v465_v57 = vsel %vm302_vm1, %v405_v22, 0.0 }
  0x5d   : > { %v365_v21 = vadd.f32 %v364_v30, %v363_v34  ;;  %v452_v14 = vadd.f32 %v451_v23, %v450_v37  ;;  %vm373_vm4 = vcmask 122880  }
  0x5e   : > { %v467_v62 = vsel %vm302_vm1, %v406_v29, 0.0  ;;  %v469_v17 = vsel %vm302_vm1, %v407_v58, 0.0 }
  0x5f   : > { %v366_v51 = vrot.slane %v365_v21, 4  ;;  %v454_v35 = vadd.f32 %v453_v28, %v452_v14 }
  0x61   : > { %v367_v45 = vadd.f32 %v366_v51, %v365_v21  ;;  %v456_v32 = vadd.f32 %v455_v50, %v454_v35 }
  0x63   : > { %v368_v55 = vrot.slane %v367_v45, 2  ;;  %v458_v12 = vadd.f32 %v457_v41, %v456_v32 }
  0x65   : > { %v369_v49 = vadd.f32 %v368_v55, %v367_v45  ;;  %v460_v53 = vadd.f32 %v459_v46, %v458_v12 }
  0x67   : > { %v370_v33 = vrot.slane %v369_v49, 1  ;;  %v462_v56 = vadd.f32 %v461_v36, %v460_v53 }
  0x69   : > { %v371_v61 = vadd.f32 %v370_v33, %v369_v49  ;;  %v464_v48 = vadd.f32 %v463_v54, %v462_v56 }
  0x6b   : > { %v372_v0 = vadd.f32 %v371_v61, %v301_v13  ;;  %v466_v38 = vadd.f32 %v465_v57, %v464_v48 }
  0x6d   : > { %374 = vst.msk [vmem:[#allocation2] sm:$0x1] %vm373_vm4, %v372_v0  ;;  %v468_v1 = vadd.f32 %v467_v62, %v466_v38 }
  0x6f   : > { %v470_v59 = vadd.f32 %v469_v17, %v468_v1 }
  0x71   : > { %v471_v7 = vrot.slane %v470_v59, 4 }
  0x73   : > { %v472_v52 = vadd.f32 %v471_v7, %v470_v59 }
  0x74   : > { %v483_v15 = vld [vmem:[#allocation2] sm:$0x1] (!%p569_p5) }
  0x75   : > { %v473_v44 = vrot.slane %v472_v52, 2  ;;  %v484_v18 = vmul.f32 (!%p569_p5), 0.001953125, %v483_v15 }
  0x77   : > { %v474_v8 = vadd.f32 %v473_v44, %v472_v52  ;;  %v487_v4 = vmul.f32 (!%p569_p5), %v484_v18, %v484_v18  ;;  %489 = vst.msk [vmem:[#allocation4] sm:$0x1] (!%p569_p5), %vm373_vm4, %v484_v18 }
  0x79   : > { %v475_v11 = vrot.slane %v474_v8, 1  ;;  %482 = sbr.rel (%p569_p5) target bundleno = 153 (0x99), region = 32 }
  0x7b   : > { %v476_v31 = vadd.f32 %v475_v11, %v474_v8 }
  0x7d   : > { %v477_v39 = vadd.f32 %v476_v31, %v375_v5 }
  0x7f   : > { %478 = vst.msk [vmem:[#allocation3] sm:$0x1] %vm373_vm4, %v477_v39 }
  0x86   : > { %v485_v63 = vld [vmem:[#allocation3] sm:$0x1] }
  0x87   : > { %v486_v19 = vmul.f32 0.001953125, %v485_v63 }
  0x89   : > { %v488_v60 = vsub.f32 %v486_v19, %v487_v4 }
  0x8b   : > { %v490_v20 = vadd.f32 1e-05, %v488_v60 }
  0x8d   : > { %599 = vrsqrt.f32 %v490_v20 }
  0x97   : > { %v600_v42 = vpop.eup %599 }
  0x98   : > { %492 = vst.msk [vmem:[#allocation6] sm:$0x1] %vm373_vm4, %v600_v42 }
  0x99 PF: > { %p584_p6 = scmp.eq.s32.totalorder %s693_s10, 1  ;;  %s670_s17 = smov [#allocation4]  }
  0x9a   : > { %s500_s18 = sshll.u32 %s670_s17, 4  ;;  %s671_s19 = smov [#allocation6]   ;;  %s501_s18 = int_to_ptr.vmem [resolvable:$true] %s500_s18 }
  0x9b   : > { %s511_s20 = sshll.u32 %s671_s19, 4  ;;  %s601_s21 = scalar_lea.vmem %s501_s18, 16  ;;  %s512_s20 = int_to_ptr.vmem [resolvable:$true] %s511_s20 }
  0x9c   : > { %p602_p7 = scmp.ne.s32.totalorder %s501_s18, %s601_s21  ;;  %s607_s22 = scalar_lea.vmem %s501_s18, 32 }
  0x9d   : > { %p608_p10 = scmp.lt.s32.totalorder %s501_s18, %s501_s18  ;;  %p609_p11 = scmp.lt.s32.totalorder %s607_s22, %s601_s21 }
  0x9e   : > { %p603_p8 = pnand %p602_p7, %p584_p6 }
  0x9f   : > { %p610_p12 = por %p609_p11, %p608_p10 }
  0xa0   : > { %p604_p9 = pneg %p603_p8 }
  0xa2   : > { %p611_p13 = pnand %p610_p12, %p604_p9 }
  0xa4   : > { %614 = shalt.err (!%p611_p13)
}
  0xa5   : > { %s615_s25 = scalar_lea.hbm %s1101_s1, 16 }
  0xa6   : > { %p616_p0 = scmp.ne.s32.totalorder %s1101_s1, %s615_s25  ;;  %p621_p3 = scmp.lt.u32.totalorder %s615_s25, %s1101_s1 }
  0xa8   : > { %p617_p1 = pnand %p616_p0, %p584_p6 }
  0xaa   : > { %p618_p2 = pneg %p617_p1 }
  0xac   : > { %p623_p4 = pnand %p621_p3, %p618_p2 }
  0xae   : > { %626 = shalt.err (!%p623_p4)
}
  0xaf   : > { %577 = dma.vmem_to_hbm [thread:$0]  (%p584_p6), %s501_s18, 16, %s1101_s1, [#allocation5]  }
  0xb0   : > { %s627_s4 = scalar_lea.vmem %s512_s20, 16  ;;  %s633_s5 = scalar_lea.vmem %s512_s20, 32 }
  0xb1   : > { %p628_p5 = scmp.ne.s32.totalorder %s512_s20, %s627_s4  ;;  %p634_p9 = scmp.lt.s32.totalorder %s512_s20, %s512_s20 }
  0xb2   : > { %p635_p10 = scmp.lt.s32.totalorder %s633_s5, %s627_s4 }
  0xb3   : > { %p629_p7 = pnand %p628_p5, %p584_p6 }
  0xb4   : > { %p636_p11 = por %p635_p10, %p634_p9 }
  0xb5   : > { %p630_p8 = pneg %p629_p7 }
  0xb7   : > { %p637_p12 = pnand %p636_p11, %p630_p8 }
  0xb9   : > { %640 = shalt.err (!%p637_p12)
}
  0xba   : > { %s641_s8 = scalar_lea.hbm %s1102_s2, 16 }
  0xbb   : > { %p642_p13 = scmp.ne.s32.totalorder %s1102_s2, %s641_s8  ;;  %p647_p2 = scmp.lt.u32.totalorder %s641_s8, %s1102_s2 }
  0xbd   : > { %p643_p0 = pnand %p642_p13, %p584_p6 }
  0xbf   : > { %p644_p1 = pneg %p643_p0 }
  0xc1   : > { %p649_p3 = pnand %p647_p2, %p644_p1 }
  0xc3   : > { %652 = shalt.err (!%p649_p3)
}
  0xc4   : > { %579 = dma.vmem_to_hbm [thread:$0]  (%p584_p6), %s512_s20, 16, %s1102_s2, [#allocation7]  }
  0xc5   : > { %658 = dma.done.wait (%p584_p6), [#allocation5], 16  }
  0xc6   : > { %660 = vsyncadd (%p584_p6), [#allocation5], 4294967280 }
  0xc7   : > { %662 = dma.done.wait (%p584_p6), [#allocation7], 16  }
  0xc8   : > { %664 = vsyncadd (%p584_p6), [#allocation7], 4294967280 }
  0xc9 PF: > { %s15_s9 = sadd.s32 1, %s667_s9  }
  0xca   : > { %p12_p4 = scmp.ge.s32.totalorder %s15_s9, 4  }
  0xcc   :  { %14 = sbr.rel (!%p12_p4) target bundleno = 2 (0x2), region = 67 }
  0xd3   :  { %528 = vsyncpa [#allocation5], 1 }
  0xd4   :  { %530 = vsyncpa [#allocation5 + $0x1], 1 }
  0xd5   :  { %531 = vsyncpa [#allocation7], 1 }

</bundles_post_ra>
